<compile_context>
chip_gen: v7x
topology: tpu7x:2x2x1
jax: 0.10.0
libtpu: 0.0.40
codegen_flags: <defaults>
</compile_context>

<pallas_src>
import jax
import jax.numpy as jnp
from jax.experimental import pallas as pl
from jax.experimental.pallas import tpu as pltpu


def _pc_softmax_kernel(x_ref, w_ref, o_ref):
    # x_ref / o_ref: VMEM (C, TILE_HW) logits / output tile (any float dtype).
    # w_ref: VMEM (C, 1) float32 class proportions (constant across the grid).
    x = x_ref[...].astype(jnp.float32)                    # (C, T) f32
    w = w_ref[...]                                        # (C, 1) f32
    m = jnp.max(x, axis=0, keepdims=True)                 # (1, T) per-pixel max over C
    e = jnp.exp(x - m)                                    # (C, T)
    # Vectorized weighted denominator: one VPU mul + one XLU sublane reduce.
    denom = jnp.sum(e * w, axis=0, keepdims=True)         # (1, T)
    # EUP approx reciprocal + one Newton step -> f32-accurate, frees VALU slots.
    inv = pl.reciprocal(denom, approx=True)
    inv = inv * (2.0 - denom * inv)
    o_ref[...] = (e * inv).astype(o_ref.dtype)


def _round_up(x, m):
    return ((x + m - 1) // m) * m


def _choose_tile_hw(C, HW, dtype, target_block_bytes, vmem_budget_bytes):
    """Pick a lane-dense spatial tile (multiple of 128).

    target_block_bytes ~ size of one HBM-dtype input block; the tile is also
    capped so (2x in + 2x out double buffers + ~3 f32 intermediate blocks)
    stays under vmem_budget_bytes.
    """
    itemsize = jnp.dtype(dtype).itemsize
    sub_io = max(8, 32 // itemsize)            # sublane granularity: 8 f32, 16 bf16, 32 i8
    c_io = _round_up(C, sub_io)                # padded channels, HBM-side dtype
    c_f32 = _round_up(C, 8)                    # padded channels, f32 intermediates
    io_bytes_per_pos = c_io * itemsize
    f32_bytes_per_pos = c_f32 * 4
    t_target = target_block_bytes // io_bytes_per_pos
    per_pos_total = 4 * io_bytes_per_pos + 3 * f32_bytes_per_pos
    t_cap = vmem_budget_bytes // per_pos_total
    t = min(t_target, t_cap)
    t = max((t // 128) * 128, 128)
    if HW <= t:
        return HW                              # single block: full-dim is always legal
    return t


def pc_softmax(logits_nchw, lb_proportion, *, tile_hw=None,
               target_block_bytes=4 << 20,     # ~4 MiB input block (85%+ roofline v6e)
               vmem_budget_bytes=36 << 20,     # keep total footprint well under v7x 64 MiB
               vmem_limit_bytes=48 << 20):
    """PCSoftmax forward. logits_nchw: (N, C, H, W); lb_proportion: (C,)."""
    N, C, H, W = logits_nchw.shape
    lb = jnp.asarray(lb_proportion, jnp.float32).reshape(-1)
    assert lb.shape[0] == C
    w_col = lb.reshape(C, 1)                   # (C, 1) weight column, fetched once
    HW = H * W
    x3 = logits_nchw.reshape(N, C, HW)         # contiguous: no data movement
    if tile_hw is None:
        tile_hw = _choose_tile_hw(C, HW, x3.dtype, target_block_bytes,
                                  vmem_budget_bytes)
    grid = (N, pl.cdiv(HW, tile_hw))

    itemsize = jnp.dtype(x3.dtype).itemsize
    cost = pl.CostEstimate(
        flops=5 * N * C * HW,
        transcendentals=N * C * HW,
        bytes_accessed=2 * N * C * HW * itemsize + C * 4,
    )

    out3 = pl.pallas_call(
        _pc_softmax_kernel,
        out_shape=jax.ShapeDtypeStruct((N, C, HW), x3.dtype),
        grid=grid,
        in_specs=[
            pl.BlockSpec((None, C, tile_hw), lambda n, j: (n, 0, j)),
            pl.BlockSpec((C, 1), lambda n, j: (0, 0)),   # constant -> no re-DMA
        ],
        out_specs=pl.BlockSpec((None, C, tile_hw), lambda n, j: (n, 0, j)),
        compiler_params=pltpu.CompilerParams(
            dimension_semantics=("parallel", "parallel"),
            vmem_limit_bytes=vmem_limit_bytes),
        cost_estimate=cost,
    )(x3, w_col)
    return out3.reshape(N, C, H, W)


def _pc_softmax_ref(logits, w):
    # pure-JAX reference mirroring the PyTorch code
    Wb = w.reshape(1, -1, 1, 1)
    l = logits - jnp.max(logits, axis=1, keepdims=True)
    e = jnp.exp(l)
    return e / jnp.sum(Wb * e, axis=1, keepdims=True)


if __name__ == "__main__":
    key = jax.random.PRNGKey(0)
    N, C, H, W = 2, 4, 16, 16
    logits = jax.random.normal(key, (N, C, H, W), dtype=jnp.float32)
    # deterministic class proportions (sum to 1), as the module's lb_proportion
    lb_proportion = jnp.array([0.1, 0.2, 0.3, 0.4], dtype=jnp.float32)

    out = pc_softmax(logits, lb_proportion)
    out = jax.block_until_ready(out)

    ref = _pc_softmax_ref(logits, lb_proportion)
    assert out.shape == (N, C, H, W)
    assert jnp.allclose(out, ref, atol=1e-5, rtol=1e-5)
    print("KERNEL_OK")
</pallas_src>

<mosaic_0001>
module attributes {stable_mosaic.version = 11 : i64} {
  func.func @_pc_softmax_kernel(%arg0: i32, %arg1: i32, %arg2: memref<1x4x256xf32, #tpu.memory_space<vmem>>, %arg3: memref<4x1xf32, #tpu.memory_space<vmem>>, %arg4: memref<1x4x256xf32, #tpu.memory_space<vmem>>) attributes {dimension_semantics = [#tpu.dimension_semantics<parallel>, #tpu.dimension_semantics<parallel>], iteration_bounds = array<i64: 2, 1>, scalar_prefetch = 0 : i64, scratch_operands = 0 : i64, tpu.core_type = #tpu.core_type<tc>, window_params = [{transform_indices = @transform_0, window_bounds = array<i64: 1, 4, 256>}, {pipeline_mode = #tpu.pipeline_mode<synchronous>, transform_indices = @transform_1, window_bounds = array<i64: 4, 1>}, {transform_indices = @transform_2, window_bounds = array<i64: 1, 4, 256>}]} {
    %c0 = arith.constant 0 : index
    %c0_0 = arith.constant 0 : index
    %c0_1 = arith.constant 0 : index
    %0 = vector.load %arg2[%c0, %c0_0, %c0_1] : memref<1x4x256xf32, #tpu.memory_space<vmem>>, vector<1x4x256xf32>
    %1 = vector.shape_cast %0 : vector<1x4x256xf32> to vector<4x256xf32>
    %c0_2 = arith.constant 0 : index
    %c0_3 = arith.constant 0 : index
    %2 = vector.load %arg3[%c0_2, %c0_3] : memref<4x1xf32, #tpu.memory_space<vmem>>, vector<4x1xf32>
    %cst = arith.constant dense<0xFF800000> : vector<256xf32>
    %3 = vector.multi_reduction <maximumf>, %1, %cst [0] : vector<4x256xf32> to vector<256xf32>
    %4 = vector.shape_cast %3 : vector<256xf32> to vector<1x256xf32>
    %5 = vector.broadcast %4 : vector<1x256xf32> to vector<4x256xf32>
    %6 = arith.subf %1, %5 : vector<4x256xf32>
    %7 = math.exp %6 : vector<4x256xf32>
    %8 = vector.broadcast %2 : vector<4x1xf32> to vector<4x256xf32>
    %9 = arith.mulf %7, %8 : vector<4x256xf32>
    %cst_4 = arith.constant dense<0.000000e+00> : vector<256xf32>
    %10 = vector.multi_reduction <add>, %9, %cst_4 [0] : vector<4x256xf32> to vector<256xf32>
    %11 = vector.shape_cast %10 : vector<256xf32> to vector<1x256xf32>
    %12 = tpu.reciprocal %11 {approx = true} : vector<1x256xf32> -> vector<1x256xf32>
    %13 = arith.mulf %11, %12 : vector<1x256xf32>
    %cst_5 = arith.constant 2.000000e+00 : f32
    %14 = vector.broadcast %cst_5 : f32 to vector<1x256xf32>
    %15 = arith.subf %14, %13 : vector<1x256xf32>
    %16 = arith.mulf %12, %15 : vector<1x256xf32>
    %17 = vector.broadcast %16 : vector<1x256xf32> to vector<4x256xf32>
    %18 = arith.mulf %7, %17 : vector<4x256xf32>
    %c0_6 = arith.constant 0 : index
    %c0_7 = arith.constant 0 : index
    %c0_8 = arith.constant 0 : index
    %19 = vector.load %arg4[%c0_6, %c0_7, %c0_8] : memref<1x4x256xf32, #tpu.memory_space<vmem>>, vector<1x4x256xf32>
    %20 = vector.shape_cast %19 : vector<1x4x256xf32> to vector<4x256xf32>
    %21 = vector.shape_cast %18 : vector<4x256xf32> to vector<1x4x256xf32>
    tpu.vector_store %arg4[%c0_6, %c0_7, %c0_8], %21 {strides = array<i32>} : memref<1x4x256xf32, #tpu.memory_space<vmem>>, vector<1x4x256xf32>,
    return
  }
  func.func @transform_0(%arg0: i32, %arg1: i32) -> (i32, i32, i32) {
    %c0_i32 = arith.constant 0 : i32
    %c0_i32_0 = arith.constant 0 : i32
    return %arg0, %c0_i32, %arg1 : i32, i32, i32
  }
  func.func @transform_1(%arg0: i32, %arg1: i32) -> (i32, i32) {
    %c0_i32 = arith.constant 0 : i32
    %c0_i32_0 = arith.constant 0 : i32
    %c0_i32_1 = arith.constant 0 : i32
    return %c0_i32, %c0_i32_0 : i32, i32
  }
  func.func @transform_2(%arg0: i32, %arg1: i32) -> (i32, i32, i32) {
    %c0_i32 = arith.constant 0 : i32
    %c0_i32_0 = arith.constant 0 : i32
    return %arg0, %c0_i32, %arg1 : i32, i32, i32
  }
}

</mosaic_0001>

<bundles_post_ra>
// kernel: tpu_custom_call.1
= control target key start
LH: loop header
LB: loop body
LE: loop exit
PB: predicated region body
PF: predicated region fallthrough
CT: control target
= control target key end

     0   :  { %7 = vsyncpa [#allocation3], 0  ;;  %s757_s0 = inlined_call_operand.hbm [shape: f32[2,4,256], index: 0, kind: input, shape index: {}]   ;;  %s758_s1 = inlined_call_operand.vmem [shape: f32[4,1], index: 1, kind: input, shape index: {}]   ;;  %s759_s2 = inlined_call_operand.hbm [shape: f32[2,4,256], index: 2, kind: output, shape index: {}]  }
   0x1   :  { %9 = vsyncpa [#allocation3 + $0x1], 0 }
   0x2   :  { %10 = vsyncpa [#allocation4], 0 }
   0x3   :  { %12 = vsyncpa [#allocation4 + $0x1], 0  ;;  %s574_s9 = smov 0   ;;  %s576_s10 = smov 0  }
   0x4   :  { %s578_s11 = smov 0   ;;  %s580_s12 = smov 0  }
   0x5   :  { %s582_s13 = smov 0   ;;  %s584_s14 = smov 0  }
   0x6 LB: > { %s352_s15 = sadd.s32 4294967295, %s553_s14   ;;  %s353_s16 = sadd.s32 4294967294, %s553_s14   ;;  %s553_s14 = sphi %s584_s14, %s18_s14   ;;  %s549_s13 = sphi %s582_s13, %s775_s13   ;;  %s545_s12 = sphi %s580_s12, %s774_s12   ;;  %s541_s11 = sphi %s578_s11, %s773_s11   ;;  %s537_s10 = sphi %s576_s10, %s772_s10   ;;  %s533_s9 = sphi %s574_s9, %s771_s9  }
   0x7   : > { %s30_s17 = sadd.s32 1, %s549_s13  ;;  %s39_s18 = sadd.s32 1, %s541_s11 }
   0x8   : > { %p32_p0 = scmp.ge.s32.totalorder %s30_s17, 2  ;;  %p46_p1 = scmp.ne.s32.totalorder %s541_s11, %s537_s10 }
   0x9   : > { %p47_p2 = scmp.eq.s32.totalorder %s553_s14, 0  ;;  %p52_p3 = scmp.ne.s32.totalorder %s537_s10, %s533_s9 }
   0xa   : > { %s777_s17 = smov (%p32_p0, %s30_s17), 0  ;;  %p53_p5 = scmp.eq.s32.totalorder %s352_s15, 0 }
   0xb   : > { %p615_p4 = por %p47_p2, %p46_p1  ;;  %s34_s20 = ssub.s32 %s549_s13, %s777_s17 }
   0xc   : > { %p99_p6 = scmp.eq.s32.totalorder %s352_s15, 1  ;;  %p37_p7 = scmp.eq.s32.totalorder %s34_s20, 0 }
   0xd   : > { %p621_p8 = por %p53_p5, %p52_p3  ;;  %p105_p10 = scmp.eq.s32.totalorder %s353_s16, 1 }
   0xe   : > { %p625_p9 = por %p99_p6, %p46_p1  ;;  %p381_p13 = scmp.lt.s32.totalorder %s553_s14, 2 }
   0xf   : > { %s630_s23 = scalar_select %p37_p7, %s541_s11, %s39_s18  }
  0x10   : > { %s763_s22 = scalar_select %p625_p9, 1, 0 }
  0x11   : > { %p632_p11 = por %p105_p10, %p52_p3  ;;  %s128_s25 = sand.u32 1, %s541_s11  }
  0x12   : > { %s356_s26 = sshll.u32 %s128_s25, 3  ;;  %s367_s27 = sshll.u32 %s549_s13, 7 }
  0x13   : > { %s764_s24 = scalar_select %p632_p11, 1, 0 }
  0x14   : > { %s643_s30 = scalar_lea.hbm %s757_s0, %s367_s27  ;;  %s132_s3 = scalar_lea.vmem [#allocation2], %s356_s26 }
  0x15   : > { %s142_s4 = sshll.u32 %s132_s3, 4  ;;  %p649_p0 = pnand %p381_p13, %p615_p4  ;;  %s645_s4 = int_to_ptr.vmem [resolvable:$true] %s142_s4 }
  0x16   : > { %s129_s6 = scalar_lea.sflag [#allocation3], %s128_s25  ;;  %s441_s7 = scalar_lea.hbm %s643_s30, 128 }
  0x17   : > { %p442_p3 = scmp.ne.s32.totalorder %s643_s30, %s441_s7  ;;  %p443_p5 = pneg %p649_p0 }
  0x18   : > { %s446_s16 = scalar_lea.hbm %s757_s0, 256  ;;  %p447_p4 = scmp.lt.u32.totalorder %s643_s30, %s757_s0 }
  0x19   : > { %p444_p6 = pnand %p443_p5, %p442_p3  ;;  %p448_p10 = scmp.lt.u32.totalorder %s446_s16, %s441_s7 }
  0x1a   : > { %p450_p12 = scmp.lt.u32.totalorder %s441_s7, %s643_s30 }
  0x1b   : > { %p445_p7 = pneg %p444_p6  ;;  %p449_p13 = por %p448_p10, %p447_p4 }
  0x1d   : > { %p451_p1 = por %p450_p12, %p449_p13 }
  0x1f   : > { %p452_p2 = pnand %p451_p1, %p445_p7 }
  0x21   : > { %455 = shalt.err (!%p452_p2)
}
  0x22   : > { %s456_s20 = scalar_lea.vmem %s645_s4, 128  ;;  %s555_s25 = smov [#allocation2]  }
  0x23   : > { %p457_p3 = scmp.ne.s32.totalorder %s645_s4, %s456_s20  ;;  %s461_s26 = sshll.u32 %s555_s25, 4  ;;  %s462_s26 = int_to_ptr.vmem [resolvable:$false] %s461_s26 }
  0x24   : > { %s463_s27 = scalar_lea.vmem %s462_s26, 256  ;;  %p464_p9 = scmp.lt.s32.totalorder %s645_s4, %s462_s26 }
  0x25   : > { %p459_p6 = pnand %p457_p3, %p443_p5  ;;  %p465_p4 = scmp.lt.s32.totalorder %s463_s27, %s456_s20 }
  0x27   : > { %p460_p11 = pneg %p459_p6  ;;  %p466_p10 = por %p465_p4, %p464_p9 }
  0x29   : > { %p467_p12 = pnand %p466_p10, %p460_p11 }
  0x2b   : > { %470 = shalt.err (!%p467_p12)
}
  0x2c   : > { %376 = dma.hbm_to_vmem [thread:$0]  (!%p649_p0), %s643_s30, 128, %s645_s4, %s129_s6  }
  0x2d   : > { %p766_p1 = scmp.lt.s32.totalorder %s553_s14, 3  ;;  %p767_p2 = scmp.ge.s32.totalorder %s553_s14, 1 }
  0x2f   : > { %p148_p5 = pnand %p767_p2, %p766_p1 }
  0x30   : > { %s685_s28 = sand.u32 (!%p148_p5), 1, %s537_s10  }
  0x31   : > { %151 = sbr.rel (%p148_p5) target bundleno = 241 (0xf1), region = 28  ;;  %s360_s29 = sshll.u32 (!%p148_p5), %s685_s28, 3 }
  0x32   : > { %s154_s3 = scalar_lea.sflag (!%p148_p5), [#allocation3], %s685_s28  ;;  %s157_s5 = scalar_lea.vmem (!%p148_p5), [#allocation2], %s360_s29 }
  0x38   : > { %524 = dma.done.wait (%p621_p8), %s154_s3, 128  }
  0x39   : > { %526 = vsyncadd (%p621_p8), %s154_s3, 4294967168  ;;  %v556_v0 = vmov 0   ;;  %v181_v1 = vld [vmem:[%s758_s1] sm:$0xf]  ;;  %vm185_vm0 = vcmask 1043456   ;;  %v214_v23 = vlaneseq  ;;  %s368_s21 = sshll.u32 %s545_s12, 7 }
  0x3a   : > { %433 = vset.pattern.permute.xlu0 %v556_v0  ;;  %v180_v2 = vld [vmem:[%s157_s5] sm:$0xff]  ;;  %v557_v21 = vmov 839922192   ;;  %s177_s6 = scalar_lea.vmem [#allocation5], %s360_s29  ;;  %s708_s16 = scalar_lea.hbm %s759_s2, %s368_s21 }
  0x3b   : > { %209 = vperm.xlu0 %433, %v181_v1   ;;  %v183_v3 = vcombine.high %v180_v2, %v180_v2  ;;  %v186_v4 = vsel %vm185_vm0, %v180_v2, -inf  ;;  %v212_v22 = vunpack.c.l.s4 %v557_v21  ;;  %v215_v25 = vshrl.u32 %v214_v23, 7  ;;  %s268_s7 = sshll.u32 %s177_s6, 4  ;;  %s252_s18 = scalar_lea.sflag [#allocation4], %s685_s28  ;;  %s710_s7 = int_to_ptr.vmem [resolvable:$true] %s268_s7 }
  0x3c   : > { %v187_v6 = vrot.slane %v186_v4, 4  ;;  %s471_s19 = scalar_lea.vmem %s710_s7, 128  ;;  %p768_p9 = scmp.ne.s32.totalorder %s763_s22, 0 }
  0x3d   : > { %v193_v5 = vsel %vm185_vm0, %v183_v3, -inf  ;;  %v213_v24 = vunpack.c.0.s8 %v212_v22  ;;  %p472_p8 = scmp.ne.s32.totalorder %s710_s7, %s471_s19  ;;  %s558_s12 = smov [#allocation5]  }
  0x3e   : > { %v194_v7 = vrot.slane %v193_v5, 4  ;;  %v188_v8 = vmax.f32 %v186_v4, %v187_v6  ;;  %s475_s20 = sshll.u32 %s558_s12, 4  ;;  %s476_s20 = int_to_ptr.vmem [resolvable:$false] %s475_s20 }
  0x3f   : > { %v216_v26 = vsub.s32 %v213_v24, %v215_v25  ;;  %p473_p11 = pnand %p472_p8, %p768_p9  ;;  %s477_s25 = scalar_lea.vmem %s476_s20, 256 }
  0x40   : > { %v195_v9 = vmax.f32 %v193_v5, %v194_v7  ;;  %v189_v10 = vrot.slane %v188_v8, 2  ;;  %p478_p7 = scmp.lt.s32.totalorder %s710_s7, %s476_s20  ;;  %p479_p13 = scmp.lt.s32.totalorder %s477_s25, %s471_s19 }
  0x41   : > { %p474_p0 = pneg %p473_p11 }
  0x42   : > { %v196_v11 = vrot.slane %v195_v9, 2  ;;  %v190_v12 = vmax.f32 %v188_v8, %v189_v10  ;;  %p480_p3 = por %p479_p13, %p478_p7 }
  0x44   : > { %v197_v13 = vmax.f32 %v195_v9, %v196_v11  ;;  %v191_v14 = vrot.slane %v190_v12, 1  ;;  %p481_p6 = pnand %p480_p3, %p474_p0 }
  0x46   : > { %v198_v15 = vrot.slane %v197_v13, 1  ;;  %v192_v16 = vmax.f32 %v190_v12, %v191_v14 }
  0x48   : > { %v199_v17 = vmax.f32 %v197_v13, %v198_v15 }
  0x4a   : > { %v202_v18 = vcombine.low %v192_v16, %v199_v17 }
  0x4c   : > { %v204_v19 = vsub.f32 %v180_v2, %v202_v18 }
  0x4e   : > { %v205_v20 = vmul.f32 1.442695, %v204_v19 }
  0x50   : > { %435 = vpow2.f32 %v205_v20 }
  0x5a   : > { %v436_v27 = vpop.eup %435 }
  0xba   : > { %v210_v28 = vpop.permute.xlu0 %209 }
  0xbb   : > { %v217_v29 = vrot.slane %v210_v28, %v216_v26 }
  0xbd   : > { %v219_v30 = vmul.f32 %v436_v27, %v217_v29 }
  0xbf   : > { %v221_v31 = vcombine.high %v219_v30, %v219_v30  ;;  %v223_v32 = vsel %vm185_vm0, %v219_v30, 0.0 }
  0xc0   : > { %v224_v33 = vrot.slane %v223_v32, 4 }
  0xc1   : > { %v230_v34 = vsel %vm185_vm0, %v221_v31, 0.0 }
  0xc2   : > { %v225_v35 = vadd.f32 %v224_v33, %v223_v32  ;;  %v231_v36 = vrot.slane %v230_v34, 4 }
  0xc4   : > { %v226_v37 = vrot.slane %v225_v35, 2  ;;  %v232_v38 = vadd.f32 %v231_v36, %v230_v34 }
  0xc6   : > { %v227_v39 = vadd.f32 %v226_v37, %v225_v35  ;;  %v233_v40 = vrot.slane %v232_v38, 2 }
  0xc8   : > { %v228_v41 = vrot.slane %v227_v39, 1  ;;  %v234_v42 = vadd.f32 %v233_v40, %v232_v38 }
  0xca   : > { %v229_v43 = vadd.f32 %v228_v41, %v227_v39  ;;  %v235_v44 = vrot.slane %v234_v42, 1 }
  0xcc   : > { %v236_v45 = vadd.f32 %v235_v44, %v234_v42  ;;  %437 = vrcp.f32 %v229_v43 }
  0xce   : > { %439 = vrcp.f32 %v236_v45 }
  0xd6   : > { %v438_v46 = vpop.eup %437 }
  0xd7   : > { %v239_v47 = vmul.f32 %v438_v46, %v229_v43 }
  0xd8   : > { %v440_v48 = vpop.eup %439 }
  0xd9   : > { %v240_v49 = vmul.f32 %v440_v48, %v236_v45  ;;  %v241_v50 = vsub.f32 2.0, %v239_v47 }
  0xdb   : > { %v242_v51 = vsub.f32 2.0, %v240_v49  ;;  %v243_v52 = vmul.f32 %v438_v46, %v241_v50 }
  0xdd   : > { %v244_v53 = vmul.f32 %v440_v48, %v242_v51 }
  0xdf   : > { %v247_v54 = vcombine.low %v243_v52, %v244_v53 }
  0xe1   : > { %v249_v55 = vmul.f32 %v436_v27, %v247_v54 }
  0xe3   : > { %250 = vst [vmem:[%s177_s6] sm:$0xff] %v249_v55 }
  0xe4   : > { %484 = shalt.err (!%p481_p6)
}
  0xe5   : > { %s485_s26 = scalar_lea.hbm %s708_s16, 128  ;;  %s489_s29 = scalar_lea.hbm %s759_s2, 256 }
  0xe6   : > { %p486_p4 = scmp.ne.s32.totalorder %s708_s16, %s485_s26  ;;  %p490_p1 = scmp.lt.u32.totalorder %s708_s16, %s759_s2 }
  0xe7   : > { %p491_p2 = scmp.lt.u32.totalorder %s489_s29, %s485_s26  ;;  %p493_p8 = scmp.lt.u32.totalorder %s485_s26, %s708_s16 }
  0xe8   : > { %p487_p10 = pnand %p486_p4, %p768_p9 }
  0xe9   : > { %p492_p5 = por %p491_p2, %p490_p1 }
  0xea   : > { %p488_p12 = pneg %p487_p10 }
  0xeb   : > { %p494_p11 = por %p493_p8, %p492_p5 }
  0xed   : > { %p495_p0 = pnand %p494_p11, %p488_p12 }
  0xef   : > { %498 = shalt.err (!%p495_p0)
}
  0xf0   : > { %371 = dma.vmem_to_hbm [thread:$0]  (%p768_p9), %s710_s7, 128, %s708_s16, %s252_s18  }
  0xf1 PF: > { %s280_s30 = sand.u32 1, %s533_s9   ;;  %p769_p7 = scmp.ne.s32.totalorder %s764_s24, 0 }
  0xf2   : > { %p770_p13 = scmp.ge.s32.totalorder %s553_s14, 2  ;;  %s281_s4 = scalar_lea.sflag [#allocation4], %s280_s30 }
  0xf4   : > { %p378_p3 = pnand %p770_p13, %p769_p7 }
  0xf6   : > { %528 = dma.done.wait (!%p378_p3), %s281_s4, 128  }
  0xf7   : > { %530 = vsyncadd (!%p378_p3), %s281_s4, 4294967168  ;;  %s18_s14 = sadd.s32 1, %s553_s14   ;;  %s771_s9 = smov %s537_s10 }
  0xf8   : > { %p15_p6 = scmp.ge.s32.totalorder %s18_s14, 4   ;;  %s772_s10 = smov %s541_s11 }
  0xf9   : > { %s773_s11 = smov %s630_s23  ;;  %s774_s12 = smov %s549_s13 }
  0xfa   : > { %s775_s13 = smov %s777_s17  ;;  %17 = sbr.rel (!%p15_p6) target bundleno = 6 (0x6), region = 73 }
 0x101   :  { %286 = vsyncpa [#allocation3], 1 }
 0x102   :  { %288 = vsyncpa [#allocation3 + $0x1], 1 }
 0x103   :  { %289 = vsyncpa [#allocation4], 1 }
 0x104   :  { %291 = vsyncpa [#allocation4 + $0x1], 1 }

</bundles_post_ra>
